<compile_context>
chip_gen: v6e
topology: v6e:2x2x1
jax: 0.10.0
libtpu: 0.0.40
codegen_flags: <defaults>
</compile_context>

<pallas_src>
import jax
import jax.numpy as jnp
import numpy as np
from jax.experimental import pallas as pl
from jax.experimental.pallas import tpu as pltpu


_VIRTUAL_ROWS = (1, 2, 5, 8, 9, 12)   # openpose rows overwritten by the module


def make_virtual_joint_matrices(neck_uv, pelvis_uv, shoulder_uv, hip_uv,
                                *, j_raw=24, j_14=14, j_op=25):
    """Bakes the module's buffers into two constant combination matrices.

    For the six virtual rows:
        out[o, :] = sum_j W_raw[o, j] * raw[j, :] + sum_j W_j14[o, j] * j14[j, :]
    Both matrices are zero on every other row.
    """
    w_raw = np.zeros((j_op, j_raw), np.float32)
    w_j14 = np.zeros((j_op, j_14), np.float32)

    # pelvis -> openpose[8] = sum(raw[0:3] * [1-2p, p, p])
    w_raw[8, 0], w_raw[8, 1], w_raw[8, 2] = 1.0 - 2.0 * pelvis_uv, pelvis_uv, pelvis_uv
    # neck -> openpose[1] = sum(raw[12:15] * [1-2n, n, n])
    w_raw[1, 12], w_raw[1, 13], w_raw[1, 14] = 1.0 - 2.0 * neck_uv, neck_uv, neck_uv
    # shoulders: [1-neck-clav, neck, clav] over raw[[16,12,13]] / raw[[17,12,14]]
    s0 = 1.0 - shoulder_uv["neck"] - shoulder_uv["clavicle"]
    s1, s2 = shoulder_uv["neck"], shoulder_uv["clavicle"]
    w_raw[5, 16], w_raw[5, 12], w_raw[5, 13] = s0, s1, s2      # left shoulder
    w_raw[2, 17], w_raw[2, 12], w_raw[2, 14] = s0, s1, s2      # right shoulder
    # hips: [hip, pelvis, 1-pelvis-hip] over (raw[1|2], raw[0], j14[1|4])
    h, p = hip_uv["hip"], hip_uv["pelvis"]
    rest = 1.0 - p - h
    w_raw[12, 1], w_raw[12, 0], w_j14[12, 1] = h, p, rest      # left hip
    w_raw[9, 2], w_raw[9, 0], w_j14[9, 4] = h, p, rest         # right hip
    return jnp.asarray(w_raw), jnp.asarray(w_j14)


def _virtual_joints_kernel(w_raw_ref, w_j14_ref, raw_ref, j14_ref, op_ref, out_ref):
    """Lane-dense refs: weights (25, J), data (J, lane_tile), out (25, lane_tile)."""
    op = op_ref[...].astype(jnp.float32)                                  # (25, T)

    # All six virtual joints in one MXU pass (rows not in _VIRTUAL_ROWS are 0).
    virt = jnp.dot(w_raw_ref[...], raw_ref[...].astype(jnp.float32),
                   preferred_element_type=jnp.float32)
    virt = virt + jnp.dot(w_j14_ref[...], j14_ref[...].astype(jnp.float32),
                          preferred_element_type=jnp.float32)

    # Row mask: keep the 19 untouched openpose rows, take the matmul result on
    # the six virtual rows.  Single dense, unmasked store of the whole block.
    row = jax.lax.broadcasted_iota(jnp.int32, op.shape, 0)
    keep = row != _VIRTUAL_ROWS[0]
    for r in _VIRTUAL_ROWS[1:]:
        keep = keep & (row != r)
    out_ref[...] = jnp.where(keep, op, virt).astype(out_ref.dtype)


def _pick_lane_tile(n):
    if n % 128 == 0:
        for t in (2048, 1024, 512, 256, 128):
            if n % t == 0:
                return t
    return n   # small / ragged batch: one full-width block (full-dim escape hatch)


@jax.jit
def virtual_joints(w_raw, w_j14, raw, j14, openpose):
    """raw: (B, J_raw, 3), j14: (B, 14, 3), openpose: (B, 25, 3) -> (B, 25, 3)."""
    b, j_op, d = openpose.shape
    j_raw, j_14 = raw.shape[1], j14.shape[1]
    n = b * d

    # Lane-dense layout: joints on sublanes, batch*xyz on lanes.
    raw_t = jnp.transpose(raw, (1, 0, 2)).reshape(j_raw, n)
    j14_t = jnp.transpose(j14, (1, 0, 2)).reshape(j_14, n)
    op_t = jnp.transpose(openpose, (1, 0, 2)).reshape(j_op, n)

    tile = _pick_lane_tile(n)
    grid = (n // tile,)

    out_t = pl.pallas_call(
        _virtual_joints_kernel,
        out_shape=jax.ShapeDtypeStruct((j_op, n), openpose.dtype),
        grid_spec=pltpu.PrefetchScalarGridSpec(
            num_scalar_prefetch=0,
            grid=grid,
            in_specs=[
                pl.BlockSpec((j_op, j_raw), lambda i: (0, 0)),   # W_raw (VMEM-resident)
                pl.BlockSpec((j_op, j_14), lambda i: (0, 0)),    # W_j14 (VMEM-resident)
                pl.BlockSpec((j_raw, tile), lambda i: (0, i)),   # raw^T
                pl.BlockSpec((j_14, tile), lambda i: (0, i)),    # j14^T
                pl.BlockSpec((j_op, tile), lambda i: (0, i)),    # openpose^T
            ],
            out_specs=pl.BlockSpec((j_op, tile), lambda i: (0, i)),
        ),
        # Reuse the transposed openpose HBM buffer as the output buffer; only
        # the six virtual rows change value (PyTorch in-place semantics).
        input_output_aliases={4: 0},
        compiler_params=pltpu.CompilerParams(
            dimension_semantics=("parallel",)),
    )(w_raw, w_j14, raw_t, j14_t, op_t)

    return out_t.reshape(j_op, b, d).transpose(1, 0, 2)


def virtual_joints_ref(raw, j14, openpose, *, neck_uv, pelvis_uv, shoulder_uv, hip_uv):
    """Pure-JAX reference reproducing the PyTorch forward semantics."""
    pw = jnp.array([1.0 - 2.0 * pelvis_uv, pelvis_uv, pelvis_uv])[:, None]
    nw = jnp.array([1.0 - 2.0 * neck_uv, neck_uv, neck_uv])[:, None]
    sw = jnp.array([1.0 - shoulder_uv["neck"] - shoulder_uv["clavicle"],
                    shoulder_uv["neck"], shoulder_uv["clavicle"]])[:, None]
    hw = jnp.array([hip_uv["hip"], hip_uv["pelvis"],
                    1.0 - hip_uv["pelvis"] - hip_uv["hip"]])[:, None]
    op = openpose
    op = op.at[:, 8, :].set(jnp.sum(raw[:, 0:3, :] * pw, axis=1))
    op = op.at[:, 1, :].set(jnp.sum(raw[:, 12:15, :] * nw, axis=1))
    op = op.at[:, 5, :].set(jnp.sum(raw[:, jnp.array([16, 12, 13]), :] * sw, axis=1))
    op = op.at[:, 2, :].set(jnp.sum(raw[:, jnp.array([17, 12, 14]), :] * sw, axis=1))
    op = op.at[:, 12, :].set(jnp.sum(
        jnp.stack([raw[:, 1, :], raw[:, 0, :], j14[:, 1, :]], axis=1) * hw, axis=1))
    op = op.at[:, 9, :].set(jnp.sum(
        jnp.stack([raw[:, 2, :], raw[:, 0, :], j14[:, 4, :]], axis=1) * hw, axis=1))
    return op


if __name__ == "__main__":
    B, J_RAW, J_14, J_OP, D = 2, 24, 14, 25, 3

    key = jax.random.PRNGKey(0)
    k_raw, k_j14, k_op = jax.random.split(key, 3)
    raw = jax.random.normal(k_raw, (B, J_RAW, D), dtype=jnp.float32)
    j14 = jax.random.normal(k_j14, (B, J_14, D), dtype=jnp.float32)
    openpose = jax.random.normal(k_op, (B, J_OP, D), dtype=jnp.float32)

    # Deterministic "module init" arguments.
    neck_uv, pelvis_uv = 0.3, 0.25
    shoulder_uv = {"neck": 0.2, "clavicle": 0.3}
    hip_uv = {"hip": 0.4, "pelvis": 0.3}

    w_raw, w_j14 = make_virtual_joint_matrices(
        neck_uv, pelvis_uv, shoulder_uv, hip_uv,
        j_raw=J_RAW, j_14=J_14, j_op=J_OP)

    out = virtual_joints(w_raw, w_j14, raw, j14, openpose)
    out = jax.block_until_ready(out)

    ref = virtual_joints_ref(raw, j14, openpose,
                             neck_uv=neck_uv, pelvis_uv=pelvis_uv,
                             shoulder_uv=shoulder_uv, hip_uv=hip_uv)
    assert out.shape == openpose.shape and out.dtype == openpose.dtype
    assert jnp.allclose(out, ref, atol=1e-3, rtol=1e-3), \
        float(jnp.max(jnp.abs(out - ref)))

    print("KERNEL_OK")
</pallas_src>

<mosaic_0001>
module attributes {stable_mosaic.version = 11 : i64} {
  func.func @_virtual_joints_kernel(%arg0: i32, %arg1: memref<25x24xf32, #tpu.memory_space<vmem>>, %arg2: memref<25x14xf32, #tpu.memory_space<vmem>>, %arg3: memref<24x6xf32, #tpu.memory_space<vmem>>, %arg4: memref<14x6xf32, #tpu.memory_space<vmem>>, %arg5: memref<25x6xf32, #tpu.memory_space<vmem>>, %arg6: memref<25x6xf32, #tpu.memory_space<vmem>>) attributes {dimension_semantics = [#tpu.dimension_semantics<parallel>], iteration_bounds = array<i64: 1>, scalar_prefetch = 0 : i64, scratch_operands = 0 : i64, tpu.core_type = #tpu.core_type<tc>, window_params = [{pipeline_mode = #tpu.pipeline_mode<synchronous>, transform_indices = @transform_0, window_bounds = array<i64: 25, 24>}, {pipeline_mode = #tpu.pipeline_mode<synchronous>, transform_indices = @transform_1, window_bounds = array<i64: 25, 14>}, {transform_indices = @transform_2, window_bounds = array<i64: 24, 6>}, {transform_indices = @transform_3, window_bounds = array<i64: 14, 6>}, {transform_indices = @transform_4, window_bounds = array<i64: 25, 6>}, {transform_indices = @transform_5, window_bounds = array<i64: 25, 6>}]} {
    %c0 = arith.constant 0 : index
    %c0_0 = arith.constant 0 : index
    %0 = vector.load %arg5[%c0, %c0_0] : memref<25x6xf32, #tpu.memory_space<vmem>>, vector<25x6xf32>
    %c0_1 = arith.constant 0 : index
    %c0_2 = arith.constant 0 : index
    %1 = vector.load %arg1[%c0_1, %c0_2] : memref<25x24xf32, #tpu.memory_space<vmem>>, vector<25x24xf32>
    %c0_3 = arith.constant 0 : index
    %c0_4 = arith.constant 0 : index
    %2 = vector.load %arg3[%c0_3, %c0_4] : memref<24x6xf32, #tpu.memory_space<vmem>>, vector<24x6xf32>
    %cst = arith.constant dense<0.000000e+00> : vector<25x6xf32>
    %3 = tpu.matmul %1, %2, %cst {dimension_numbers = #tpu.dot_dimension_numbers<[1], [0], [0], [1], [0, 0, 1, 1], [], []>} : vector<25x24xf32>, vector<24x6xf32>, vector<25x6xf32> -> vector<25x6xf32>
    %c0_5 = arith.constant 0 : index
    %c0_6 = arith.constant 0 : index
    %4 = vector.load %arg2[%c0_5, %c0_6] : memref<25x14xf32, #tpu.memory_space<vmem>>, vector<25x14xf32>
    %c0_7 = arith.constant 0 : index
    %c0_8 = arith.constant 0 : index
    %5 = vector.load %arg4[%c0_7, %c0_8] : memref<14x6xf32, #tpu.memory_space<vmem>>, vector<14x6xf32>
    %cst_9 = arith.constant dense<0.000000e+00> : vector<25x6xf32>
    %6 = tpu.matmul %4, %5, %cst_9 {dimension_numbers = #tpu.dot_dimension_numbers<[1], [0], [0], [1], [0, 0, 1, 1], [], []>} : vector<25x14xf32>, vector<14x6xf32>, vector<25x6xf32> -> vector<25x6xf32>
    %7 = arith.addf %3, %6 : vector<25x6xf32>
    %8 = tpu.iota {dimensions = array<i32: 0>} : vector<25x6xi32>
    %c1_i32 = arith.constant 1 : i32
    %9 = vector.broadcast %c1_i32 : i32 to vector<25x6xi32>
    %10 = arith.cmpi ne, %8, %9 : vector<25x6xi32>
    %c2_i32 = arith.constant 2 : i32
    %11 = vector.broadcast %c2_i32 : i32 to vector<25x6xi32>
    %12 = arith.cmpi ne, %8, %11 : vector<25x6xi32>
    %13 = arith.andi %10, %12 : vector<25x6xi1>
    %c5_i32 = arith.constant 5 : i32
    %14 = vector.broadcast %c5_i32 : i32 to vector<25x6xi32>
    %15 = arith.cmpi ne, %8, %14 : vector<25x6xi32>
    %16 = arith.andi %13, %15 : vector<25x6xi1>
    %c8_i32 = arith.constant 8 : i32
    %17 = vector.broadcast %c8_i32 : i32 to vector<25x6xi32>
    %18 = arith.cmpi ne, %8, %17 : vector<25x6xi32>
    %19 = arith.andi %16, %18 : vector<25x6xi1>
    %c9_i32 = arith.constant 9 : i32
    %20 = vector.broadcast %c9_i32 : i32 to vector<25x6xi32>
    %21 = arith.cmpi ne, %8, %20 : vector<25x6xi32>
    %22 = arith.andi %19, %21 : vector<25x6xi1>
    %c12_i32 = arith.constant 12 : i32
    %23 = vector.broadcast %c12_i32 : i32 to vector<25x6xi32>
    %24 = arith.cmpi ne, %8, %23 : vector<25x6xi32>
    %25 = arith.andi %22, %24 : vector<25x6xi1>
    %26 = arith.select %25, %0, %7 : vector<25x6xi1>, vector<25x6xf32>
    %c0_10 = arith.constant 0 : index
    %c0_11 = arith.constant 0 : index
    %27 = vector.load %arg6[%c0_10, %c0_11] : memref<25x6xf32, #tpu.memory_space<vmem>>, vector<25x6xf32>
    tpu.vector_store %arg6[%c0_10, %c0_11], %26 {strides = array<i32>} : memref<25x6xf32, #tpu.memory_space<vmem>>, vector<25x6xf32>,
    return
  }
  func.func @transform_0(%arg0: i32) -> (i32, i32) {
    %c0_i32 = arith.constant 0 : i32
    %c0_i32_0 = arith.constant 0 : i32
    %c0_i32_1 = arith.constant 0 : i32
    return %c0_i32, %c0_i32_0 : i32, i32
  }
  func.func @transform_1(%arg0: i32) -> (i32, i32) {
    %c0_i32 = arith.constant 0 : i32
    %c0_i32_0 = arith.constant 0 : i32
    %c0_i32_1 = arith.constant 0 : i32
    return %c0_i32, %c0_i32_0 : i32, i32
  }
  func.func @transform_2(%arg0: i32) -> (i32, i32) {
    %c0_i32 = arith.constant 0 : i32
    %c0_i32_0 = arith.constant 0 : i32
    return %c0_i32, %arg0 : i32, i32
  }
  func.func @transform_3(%arg0: i32) -> (i32, i32) {
    %c0_i32 = arith.constant 0 : i32
    %c0_i32_0 = arith.constant 0 : i32
    return %c0_i32, %arg0 : i32, i32
  }
  func.func @transform_4(%arg0: i32) -> (i32, i32) {
    %c0_i32 = arith.constant 0 : i32
    %c0_i32_0 = arith.constant 0 : i32
    return %c0_i32, %arg0 : i32, i32
  }
  func.func @transform_5(%arg0: i32) -> (i32, i32) {
    %c0_i32 = arith.constant 0 : i32
    %c0_i32_0 = arith.constant 0 : i32
    return %c0_i32, %arg0 : i32, i32
  }
}

</mosaic_0001>

<bundles_post_ra>
// kernel: virtual_joints.1
= control target key start
LH: loop header
LB: loop body
LE: loop exit
PB: predicated region body
PF: predicated region fallthrough
CT: control target
= control target key end

     0   :  { %vm50_vm0 = vcmask 1045504   ;;  %vm37_vm1 = vcmask 113664   ;;  %vm139_vm2 = vcmask 195584   ;;  %vm290_vm3 = vcmask 48128   ;;  %s448_s3 = inlined_call_operand.vmem [shape: f32[14,6], index: 3, kind: input, shape index: {}]   ;;  %s449_s2 = inlined_call_operand.vmem [shape: f32[24,6], index: 2, kind: input, shape index: {}]   ;;  %s450_s1 = inlined_call_operand.vmem [shape: f32[25,14], index: 1, kind: input, shape index: {}]   ;;  %s451_s0 = inlined_call_operand.vmem [shape: f32[25,24], index: 0, kind: input, shape index: {}]   ;;  %s452_s4 = inlined_call_operand.vmem [shape: f32[25,6], index: 4, kind: input, shape index: {}, may-alias: {4,5}]   ;;  %s453_s5 = inlined_call_operand.vmem [shape: f32[25,6], index: 5, kind: output, shape index: {}, may-alias: {4,5}]  }
   0x1   :  { %v36_v0 = vld [vmem:[%s448_s3 + $0x8] sm:$0x3f]  ;;  %v30_v1 = vld [vmem:[%s449_s2 + $0x10] sm:$0xff]  ;;  %v35_v2 = vld [vmem:[%s448_s3] sm:$0xff]  ;;  %vm294_vm4 = vcmask 40960   ;;  %v237_v15 = vlaneseq }
   0x2   :  { %322 = vmatprep.subr.msk.mxu0 %vm50_vm0, %v36_v0  ;;  %332 = vmatprep.subr.mxu1 %v30_v1  ;;  %v29_v3 = vld [vmem:[%s449_s2 + $0x8] sm:$0xff]  ;;  %v31_v4 = vld [vmem:[%s450_s1] sm:$0xff]  ;;  %v33_v8 = vld [vmem:[%s450_s1 + $0x10] sm:$0xff] }
   0x3   :  { %323 = vmatpush3.msk.msra.mxu0 %vm50_vm0, %v36_v0  ;;  %333 = vmatpush3.msra.mxu1 %v30_v1  ;;  %v32_v5 = vld [vmem:[%s450_s1 + $0x8] sm:$0xff]  ;;  %v28_v6 = vld [vmem:[%s449_s2] sm:$0xff]  ;;  %v34_v10 = vld [vmem:[%s450_s1 + $0x18] sm:$0x1]  ;;  %v238_v16 = vshrl.u32 %v237_v15, 7 }
   0x4   :  { %324 = vmatprep.subr.mxu0 %v35_v2  ;;  %334 = vmatprep.subr.mxu1 %v29_v3  ;;  %v24_v7 = vld [vmem:[%s451_s0] sm:$0xff]  ;;  %v25_v9 = vld [vmem:[%s451_s0 + $0x8] sm:$0xff]  ;;  %v26_v11 = vld [vmem:[%s451_s0 + $0x10] sm:$0xff] }
   0x5   :  { %325 = vmatpush3.msra.mxu0 %v35_v2  ;;  %326 = vmatprep.mubr.msk.f32.mxu0 %vm37_vm1, %v31_v4  ;;  %v27_v12 = vld [vmem:[%s451_s0 + $0x18] sm:$0x1]  ;;  %v22_v13 = vld [vmem:[%s452_s4 + $0x10] sm:$0xff]  ;;  %v239_v17 = vadd.s32 8, %v238_v16  ;;  %vm242_vm7 = vcmp.ne.s32.totalorder %v238_v16, 1  ;;  %vm246_vm8 = vcmp.ne.s32.totalorder %v238_v16, 2 }
   0x6   :  { %335 = vmatpush3.msra.mxu1 %v29_v3  ;;  %327 = vmatmul.mubr.msk.f32.vlgmr.msra.gmra.mxu0 %vm37_vm1, %v32_v5  ;;  %v23_v14 = vld [vmem:[%s452_s4 + $0x18] sm:$0x1]  ;;  %vm250_vm11 = vmand %vm242_vm7, %vm246_vm8  ;;  %vm254_vm12 = vcmp.ne.s32.totalorder %v238_v16, 5 }
   0x7   :  { %336 = vmatprep.subr.mxu1 %v28_v6  ;;  %338 = vmatprep.mubr.msk.f32.mxu1 %vm139_vm2, %v24_v7  ;;  %293 = vst.msk [vmem:[%s453_s5 + $0x10] sm:$0xff] %vm290_vm3, %v22_v13  ;;  %vm263_vm5 = vcmp.ne.s32.totalorder %v239_v17, 8  ;;  %vm271_vm6 = vcmp.ne.s32.totalorder %v239_v17, 9  ;;  %vm279_vm10 = vcmp.ne.s32.totalorder %v239_v17, 12  ;;  %vm258_vm14 = vmand %vm250_vm11, %vm254_vm12 }
   0x8   :  { %337 = vmatpush3.msra.mxu1 %v28_v6  ;;  %329 = vmatprep.mubr.msk.f32.mxu0 %vm37_vm1, %v33_v8  ;;  %295 = vst.msk [vmem:[%s453_s5 + $0x18] sm:$0x1] %vm294_vm4, %v23_v14  ;;  %vm275_vm9 = vmand %vm263_vm5, %vm271_vm6 }
   0x9   :  { %339 = vmatmul.mubr.msk.f32.vlgmr.msra.gmra.mxu1 %vm139_vm2, %v25_v9  ;;  %vm283_vm13 = vmand %vm275_vm9, %vm279_vm10 }
   0xa   :  { %330 = vmatmul.mubr.msk.f32.gmra.mxu0 %vm37_vm1, %v34_v10  ;;  %341 = vmatprep.mubr.msk.f32.mxu1 %vm139_vm2, %v26_v11 }
   0xd   :  { %342 = vmatmul.mubr.msk.f32.gmra.mxu1 %vm139_vm2, %v27_v12 }
   0xf   :  { %v21_v20 = vld [vmem:[%s452_s4 + $0x8] sm:$0xff]  ;;  %v20_v24 = vld [vmem:[%s452_s4] sm:$0xff] }
  0xc6   :  { %v328_v18 = vpop.f32.mrf.mxu0 }
  0xc8   :  { %v120_v19 = vpop.f32.mrf.mxu0 }
  0xc9   :  { %v340_v21 = vpop.f32.mrf.mxu1 }
  0xca   :  { %v224_v22 = vadd.f32 %v340_v21, %v328_v18  ;;  %v331_v23 = vpop.f32.mrf.mxu0 }
  0xcb   :  { %v218_v25 = vpop.f32.mrf.mxu1 }
  0xcc   :  { %v287_v26 = vsel %vm283_vm13, %v21_v20, %v224_v22  ;;  %v219_v27 = vadd.f32 %v218_v25, %v120_v19  ;;  %v130_v28 = vpop.f32.mrf.mxu0 }
  0xcd   :  { %292 = vst.msk [vmem:[%s453_s5 + $0x8] sm:$0xff] %vm290_vm3, %v287_v26  ;;  %v343_v29 = vpop.f32.mrf.mxu1 }
  0xce   :  { %v286_v30 = vsel %vm258_vm14, %v20_v24, %v219_v27 }
  0xcf   :  { %291 = vst.msk [vmem:[%s453_s5] sm:$0xff] %vm290_vm3, %v286_v30  ;;  %v228_v31 = vpop.f32.mrf.mxu1 }

</bundles_post_ra>
